<compile_context>
chip_gen: v5e
topology: v5e:2x2
jax: 0.10.0
libtpu: 0.0.40
codegen_flags: <defaults>
</compile_context>

<pallas_src>
import functools
import math

import jax
import jax.numpy as jnp
from jax.experimental import pallas as pl
from jax.experimental.pallas import tpu as pltpu

LANES = 128
SUBLANES = 8
MAX_TILE_ROWS = 1024  # 1024x128xf32 = 512 KiB per buffer; conservative for v7x VMEM


def _round_up(x, m):
    return ((x + m - 1) // m) * m


def _focal_loss_kernel(logits_ref, targets_ref, out_ref, *,
                       gamma, gamma_int, bce_lo, bce_hi):
    i = pl.program_id(1)

    @pl.when(i == 0)
    def _():
        out_ref[...] = jnp.zeros_like(out_ref)

    x = logits_ref[0].astype(jnp.float32)
    t = targets_ref[0].astype(jnp.float32)

    # Shared exp(-|x|); one EUP exp + one EUP log + one EUP reciprocal per element.
    e = jnp.exp(-jnp.abs(x))
    log_term = jnp.log(1.0 + e)          # = softplus(-|x|)

    # BCE against p clamped to [1e-8, 1-1e-8], computed stably in logit space:
    #   -log(clip(p))     = clip(softplus(-x), -log(1-1e-8), -log(1e-8))
    #   -log(1 - clip(p)) = clip(softplus( x), -log(1-1e-8), -log(1e-8))
    neg_log_p = jnp.clip(jnp.maximum(-x, 0.0) + log_term, bce_lo, bce_hi)
    neg_log_1mp = jnp.clip(jnp.maximum(x, 0.0) + log_term, bce_lo, bce_hi)
    bce = t * neg_log_p + (1.0 - t) * neg_log_1mp

    # p = clip(sigmoid(x)) from the same shared exp.
    s = 1.0 / (1.0 + e)                  # sigmoid(|x|)
    p = jnp.where(x >= 0.0, s, 1.0 - s)
    p = jnp.clip(p, 1e-8, 1.0 - 1e-8)
    # (1 - pt) with pt = where(t == 1, p, 1 - p)  (exact 0/1 targets, as in the module)
    one_minus_pt = jnp.where(t == 1.0, 1.0 - p, p)

    if gamma_int is not None:
        # Integer gamma: repeated multiply on the VPU instead of pow (exp+log on EUP).
        mod = None
        for _ in range(gamma_int):
            mod = one_minus_pt if mod is None else mod * one_minus_pt
        loss = bce if mod is None else mod * bce
    else:
        loss = (one_minus_pt ** gamma) * bce

    # alpha and 1/N are applied once in the wrapper epilogue.
    out_ref[0] += loss


def focal_loss(logits, targets, alpha=1.0, gamma=2.0, reduction="mean"):
    """Pallas TPU focal loss. Supports 'mean' and 'sum' (scalar) reductions."""
    assert logits.shape == targets.shape
    # TODO(synk): reduction='none' (elementwise loss output) not implemented in the kernel.
    assert reduction in ("mean", "sum"), "only scalar reductions supported"

    n = int(logits.size)

    # Keep native floating dtypes (e.g. bf16) to halve HBM traffic; cast in-kernel.
    x = logits if jnp.issubdtype(logits.dtype, jnp.floating) else logits.astype(jnp.float32)
    t = targets if jnp.issubdtype(targets.dtype, jnp.floating) else targets.astype(jnp.float32)
    x = x.reshape(-1)
    t = t.reshape(-1)

    rows = (n + LANES - 1) // LANES
    tile_rows = min(MAX_TILE_ROWS, _round_up(rows, SUBLANES))
    total_steps = (rows + tile_rows - 1) // tile_rows
    n_split = 2 if total_steps >= 2 else 1          # megacore split for v7x; harmless on v5e/v6e
    steps = (total_steps + n_split - 1) // n_split
    padded_rows = n_split * steps * tile_rows
    padded_n = padded_rows * LANES

    pad = padded_n - n
    if pad:
        # logits=-40, targets=0 -> loss contribution ~1e-24 per padded element (negligible).
        x = jnp.concatenate([x, jnp.full((pad,), -40.0, x.dtype)])
        t = jnp.concatenate([t, jnp.zeros((pad,), t.dtype)])

    x3 = x.reshape(n_split, steps * tile_rows, LANES)
    t3 = t.reshape(n_split, steps * tile_rows, LANES)

    g = float(gamma)
    gamma_int = int(g) if (g.is_integer() and 0.0 <= g <= 8.0) else None

    kernel = functools.partial(
        _focal_loss_kernel,
        gamma=g,
        gamma_int=gamma_int,
        bce_lo=float(-math.log(1.0 - 1e-8)),
        bce_hi=float(-math.log(1e-8)),
    )

    elem_bytes = x.dtype.itemsize + t.dtype.itemsize
    cost = pl.CostEstimate(
        flops=14 * padded_n,
        transcendentals=3 * padded_n,
        bytes_accessed=padded_n * elem_bytes + n_split * tile_rows * LANES * 4,
    )

    partial = pl.pallas_call(
        kernel,
        out_shape=jax.ShapeDtypeStruct((n_split, tile_rows, LANES), jnp.float32),
        grid_spec=pltpu.PrefetchScalarGridSpec(
            num_scalar_prefetch=0,
            grid=(n_split, steps),
            in_specs=[
                pl.BlockSpec((1, tile_rows, LANES), lambda c, i: (c, i, 0)),
                pl.BlockSpec((1, tile_rows, LANES), lambda c, i: (c, i, 0)),
            ],
            out_specs=pl.BlockSpec((1, tile_rows, LANES), lambda c, i: (c, 0, 0)),
        ),
        compiler_params=pltpu.CompilerParams(
            dimension_semantics=("parallel", "arbitrary"),
        ),
        cost_estimate=cost,
    )(x3, t3)

    total = jnp.sum(partial, dtype=jnp.float32)
    if reduction == "mean":
        return total * (float(alpha) / float(n))
    return total * float(alpha)


def focal_loss_ref(logits, targets, alpha=1.0, gamma=2.0, reduction="mean"):
    """Pure-JAX reference mirroring the torch module exactly."""
    p = jax.nn.sigmoid(logits.astype(jnp.float32))
    p = jnp.clip(p, 1e-8, 1.0 - 1e-8)
    t = targets.astype(jnp.float32)
    bce = -(t * jnp.log(p) + (1.0 - t) * jnp.log(1.0 - p))
    pt = jnp.where(t == 1.0, p, 1.0 - p)
    loss = alpha * (1.0 - pt) ** gamma * bce
    return loss.mean() if reduction == "mean" else loss.sum()


if __name__ == "__main__":
    key = jax.random.PRNGKey(0)
    k1, k2 = jax.random.split(key)
    # NCHW-like input: batch=2, channels=4, spatial=16x16
    logits = jax.random.normal(k1, (2, 4, 16, 16), dtype=jnp.float32)
    targets = (jax.random.uniform(k2, (2, 4, 16, 16)) > 0.5).astype(jnp.float32)

    out = focal_loss(logits, targets, alpha=1.0, gamma=2.0, reduction="mean")
    out = jax.block_until_ready(out)

    ref = focal_loss_ref(logits, targets, alpha=1.0, gamma=2.0, reduction="mean")
    assert jnp.allclose(out, ref, rtol=1e-5, atol=1e-6), (out, ref)

    # also exercise the padded / sum path
    out_sum = jax.block_until_ready(focal_loss(logits, targets, reduction="sum"))
    ref_sum = focal_loss_ref(logits, targets, reduction="sum")
    assert jnp.allclose(out_sum, ref_sum, rtol=1e-5, atol=1e-5), (out_sum, ref_sum)

    print("KERNEL_OK")
</pallas_src>

<mosaic_0001>
module attributes {stable_mosaic.version = 11 : i64} {
  func.func @_focal_loss_kernel(%arg0: i32, %arg1: i32, %arg2: memref<1x16x128xf32, #tpu.memory_space<vmem>>, %arg3: memref<1x16x128xf32, #tpu.memory_space<vmem>>, %arg4: memref<1x16x128xf32, #tpu.memory_space<vmem>>) attributes {dimension_semantics = [#tpu.dimension_semantics<parallel>, #tpu.dimension_semantics<arbitrary>], iteration_bounds = array<i64: 1, 1>, scalar_prefetch = 0 : i64, scratch_operands = 0 : i64, tpu.core_type = #tpu.core_type<tc>, window_params = [{transform_indices = @transform_0, window_bounds = array<i64: 1, 16, 128>}, {transform_indices = @transform_1, window_bounds = array<i64: 1, 16, 128>}, {transform_indices = @transform_2, window_bounds = array<i64: 1, 16, 128>}]} {
    %c0_i32 = arith.constant 0 : i32
    %0 = arith.cmpi eq, %arg1, %c0_i32 : i32
    %1 = arith.extui %0 : i1 to i32
    %c0_i32_0 = arith.constant 0 : i32
    %2 = arith.cmpi ne, %1, %c0_i32_0 : i32
    scf.if %2 {
      %cst_29 = arith.constant 0.000000e+00 : f32
      %61 = vector.broadcast %cst_29 : f32 to vector<1x16x128xf32>
      %c0_30 = arith.constant 0 : index
      %c0_31 = arith.constant 0 : index
      %c0_32 = arith.constant 0 : index
      %62 = vector.load %arg4[%c0_30, %c0_31, %c0_32] : memref<1x16x128xf32, #tpu.memory_space<vmem>>, vector<1x16x128xf32>
      tpu.vector_store %arg4[%c0_30, %c0_31, %c0_32], %61 {strides = array<i32>} : memref<1x16x128xf32, #tpu.memory_space<vmem>>, vector<1x16x128xf32>,
    } else {
    }
    %c0 = arith.constant 0 : index
    %c0_1 = arith.constant 0 : index
    %c0_2 = arith.constant 0 : index
    %3 = vector.load %arg2[%c0, %c0_1, %c0_2] : memref<1x16x128xf32, #tpu.memory_space<vmem>>, vector<1x16x128xf32>
    %4 = vector.shape_cast %3 : vector<1x16x128xf32> to vector<16x128xf32>
    %c0_3 = arith.constant 0 : index
    %c0_4 = arith.constant 0 : index
    %c0_5 = arith.constant 0 : index
    %5 = vector.load %arg3[%c0_3, %c0_4, %c0_5] : memref<1x16x128xf32, #tpu.memory_space<vmem>>, vector<1x16x128xf32>
    %6 = vector.shape_cast %5 : vector<1x16x128xf32> to vector<16x128xf32>
    %7 = math.absf %4 : vector<16x128xf32>
    %cst = arith.constant 0.000000e+00 : f32
    %8 = vector.broadcast %cst : f32 to vector<16x128xf32>
    %9 = arith.subf %8, %7 : vector<16x128xf32>
    %10 = math.exp %9 : vector<16x128xf32>
    %cst_6 = arith.constant 1.000000e+00 : f32
    %11 = vector.broadcast %cst_6 : f32 to vector<16x128xf32>
    %12 = arith.addf %11, %10 : vector<16x128xf32>
    %13 = math.log %12 : vector<16x128xf32>
    %cst_7 = arith.constant 0.000000e+00 : f32
    %14 = vector.broadcast %cst_7 : f32 to vector<16x128xf32>
    %15 = arith.subf %14, %4 : vector<16x128xf32>
    %cst_8 = arith.constant 0.000000e+00 : f32
    %16 = vector.broadcast %cst_8 : f32 to vector<16x128xf32>
    %17 = arith.maximumf %15, %16 : vector<16x128xf32>
    %18 = arith.addf %17, %13 : vector<16x128xf32>
    %cst_9 = arith.constant 9.99999993E-9 : f32
    %cst_10 = arith.constant 18.420681 : f32
    %19 = vector.broadcast %cst_9 : f32 to vector<16x128xf32>
    %20 = arith.maximumf %19, %18 : vector<16x128xf32>
    %21 = vector.broadcast %cst_10 : f32 to vector<16x128xf32>
    %22 = arith.minimumf %21, %20 : vector<16x128xf32>
    %cst_11 = arith.constant 0.000000e+00 : f32
    %23 = vector.broadcast %cst_11 : f32 to vector<16x128xf32>
    %24 = arith.maximumf %4, %23 : vector<16x128xf32>
    %25 = arith.addf %24, %13 : vector<16x128xf32>
    %cst_12 = arith.constant 9.99999993E-9 : f32
    %cst_13 = arith.constant 18.420681 : f32
    %26 = vector.broadcast %cst_12 : f32 to vector<16x128xf32>
    %27 = arith.maximumf %26, %25 : vector<16x128xf32>
    %28 = vector.broadcast %cst_13 : f32 to vector<16x128xf32>
    %29 = arith.minimumf %28, %27 : vector<16x128xf32>
    %30 = arith.mulf %6, %22 : vector<16x128xf32>
    %cst_14 = arith.constant 1.000000e+00 : f32
    %31 = vector.broadcast %cst_14 : f32 to vector<16x128xf32>
    %32 = arith.subf %31, %6 : vector<16x128xf32>
    %33 = arith.mulf %32, %29 : vector<16x128xf32>
    %34 = arith.addf %30, %33 : vector<16x128xf32>
    %cst_15 = arith.constant 1.000000e+00 : f32
    %35 = vector.broadcast %cst_15 : f32 to vector<16x128xf32>
    %36 = arith.addf %35, %10 : vector<16x128xf32>
    %cst_16 = arith.constant 1.000000e+00 : f32
    %37 = vector.broadcast %cst_16 : f32 to vector<16x128xf32>
    %38 = arith.divf %37, %36 : vector<16x128xf32>
    %cst_17 = arith.constant 0.000000e+00 : f32
    %39 = vector.broadcast %cst_17 : f32 to vector<16x128xf32>
    %40 = arith.cmpf oge, %4, %39 : vector<16x128xf32>
    %cst_18 = arith.constant 1.000000e+00 : f32
    %41 = vector.broadcast %cst_18 : f32 to vector<16x128xf32>
    %42 = arith.subf %41, %38 : vector<16x128xf32>
    %43 = arith.select %40, %38, %42 : vector<16x128xi1>, vector<16x128xf32>
    %cst_19 = arith.constant 9.99999993E-9 : f32
    %cst_20 = arith.constant 1.000000e+00 : f32
    %44 = vector.broadcast %cst_19 : f32 to vector<16x128xf32>
    %45 = arith.maximumf %44, %43 : vector<16x128xf32>
    %46 = vector.broadcast %cst_20 : f32 to vector<16x128xf32>
    %47 = arith.minimumf %46, %45 : vector<16x128xf32>
    %cst_21 = arith.constant 1.000000e+00 : f32
    %48 = vector.broadcast %cst_21 : f32 to vector<16x128xf32>
    %49 = arith.cmpf oeq, %6, %48 : vector<16x128xf32>
    %cst_22 = arith.constant 1.000000e+00 : f32
    %50 = vector.broadcast %cst_22 : f32 to vector<16x128xf32>
    %51 = arith.subf %50, %47 : vector<16x128xf32>
    %52 = arith.select %49, %51, %47 : vector<16x128xi1>, vector<16x128xf32>
    %53 = arith.mulf %52, %52 : vector<16x128xf32>
    %54 = arith.mulf %53, %34 : vector<16x128xf32>
    %c0_23 = arith.constant 0 : index
    %c0_24 = arith.constant 0 : index
    %c0_25 = arith.constant 0 : index
    %55 = vector.load %arg4[%c0_23, %c0_24, %c0_25] : memref<1x16x128xf32, #tpu.memory_space<vmem>>, vector<1x16x128xf32>
    %56 = vector.shape_cast %55 : vector<1x16x128xf32> to vector<16x128xf32>
    %57 = arith.addf %56, %54 : vector<16x128xf32>
    %c0_26 = arith.constant 0 : index
    %c0_27 = arith.constant 0 : index
    %c0_28 = arith.constant 0 : index
    %58 = vector.load %arg4[%c0_26, %c0_27, %c0_28] : memref<1x16x128xf32, #tpu.memory_space<vmem>>, vector<1x16x128xf32>
    %59 = vector.shape_cast %58 : vector<1x16x128xf32> to vector<16x128xf32>
    %60 = vector.shape_cast %57 : vector<16x128xf32> to vector<1x16x128xf32>
    tpu.vector_store %arg4[%c0_26, %c0_27, %c0_28], %60 {strides = array<i32>} : memref<1x16x128xf32, #tpu.memory_space<vmem>>, vector<1x16x128xf32>,
    return
  }
  func.func @transform_0(%arg0: i32, %arg1: i32) -> (i32, i32, i32) {
    %c0_i32 = arith.constant 0 : i32
    %c0_i32_0 = arith.constant 0 : i32
    return %arg0, %arg1, %c0_i32 : i32, i32, i32
  }
  func.func @transform_1(%arg0: i32, %arg1: i32) -> (i32, i32, i32) {
    %c0_i32 = arith.constant 0 : i32
    %c0_i32_0 = arith.constant 0 : i32
    return %arg0, %arg1, %c0_i32 : i32, i32, i32
  }
  func.func @transform_2(%arg0: i32, %arg1: i32) -> (i32, i32, i32) {
    %c0_i32 = arith.constant 0 : i32
    %c0_i32_0 = arith.constant 0 : i32
    %c0_i32_1 = arith.constant 0 : i32
    return %arg0, %c0_i32, %c0_i32_0 : i32, i32, i32
  }
}

</mosaic_0001>

<bundles_post_ra>
// kernel: tpu_custom_call.1
= control target key start
LH: loop header
LB: loop body
LE: loop exit
PB: predicated region body
PF: predicated region fallthrough
CT: control target
= control target key end

     0   :  { %7 = vsyncpa [#allocation3], 0  ;;  %s338_s0 = inlined_call_operand.hbm [shape: f32[1,16,128], index: 0, kind: input, shape index: {}]   ;;  %s339_s1 = inlined_call_operand.hbm [shape: f32[1,16,128], index: 1, kind: input, shape index: {}]   ;;  %s340_s2 = inlined_call_operand.hbm [shape: f32[1,16,128], index: 2, kind: output, shape index: {}]  }
   0x1   :  { %8 = vsyncpa [#allocation6], 0 }
   0x2   :  { %9 = vsyncpa [#allocation4], 0  ;;  %s14_s11 = sshll.u32 %s338_s0, 4  ;;  %s266_s12 = smov [#allocation2]   ;;  %s15_s11 = int_to_ptr.hbm [resolvable:$true] %s14_s11 }
   0x3   :  { %s16_s13 = sshll.u32 %s266_s12, 4  ;;  %s27_s16 = sshll.u32 %s339_s1, 4  ;;  %s17_s13 = int_to_ptr.vmem [resolvable:$true] %s16_s13  ;;  %s28_s16 = int_to_ptr.hbm [resolvable:$true] %s27_s16 }
   0x4   :  { %s267_s17 = smov 128   ;;  %s268_s18 = smov 8  }
   0x5   :  { %22 = dma.hbm_to_vmem [thread:$0]  %s15_s11, 256, %s17_s13, [#allocation3], %s267_s17, %s267_s17, %s268_s18  }
   0x6   :  { %s269_s19 = smov [#allocation5]  }
   0x7   :  { %s29_s20 = sshll.u32 %s269_s19, 4  ;;  %s30_s20 = int_to_ptr.vmem [resolvable:$true] %s29_s20 }
   0x8   :  { %35 = dma.hbm_to_vmem [thread:$0]  %s28_s16, 256, %s30_s20, [#allocation6], %s267_s17, %s267_s17, %s268_s18  }
   0x9   :  { %260 = dma.done.wait [#allocation3], 256  }
   0xa   :  { %261 = vsyncadd [#allocation3], 4294967040 }
   0xb   :  { %262 = dma.done.wait [#allocation6], 256  }
   0xc   :  { %263 = vsyncadd [#allocation6], 4294967040  ;;  %v298_v0 = vld [vmem:[#allocation2] sm:$0xff]  ;;  %v300_v1 = vld [vmem:[#allocation2 + $0x8] sm:$0xff]  ;;  %s270_s0 = smov [#allocation7]   ;;  %s156_s23 = sshll.u32 %s340_s2, 4  ;;  %s157_s23 = int_to_ptr.hbm [resolvable:$true] %s156_s23 }
   0xd   :  { %v54_v2 = vand.u32 2147483647, %v298_v0  ;;  %v55_v3 = vand.u32 2147483647, %v300_v1  ;;  %v68_v12 = vsub.f32 0.0, %v298_v0  ;;  %v69_v13 = vsub.f32 0.0, %v300_v1 }
   0xe   :  { %v78_v16 = vmax.f32 %v298_v0, 0.0  ;;  %v79_v22 = vmax.f32 %v300_v1, 0.0  ;;  %v52_v40 = vld [vmem:[#allocation5] sm:$0xff]  ;;  %v53_v48 = vld [vmem:[#allocation5 + $0x8] sm:$0xff]  ;;  %vm124_vm8 = vcmp.ge.f32.partialorder %v298_v0, 0.0  ;;  %vm125_vm9 = vcmp.ge.f32.partialorder %v300_v1, 0.0 }
   0xf   :  { %v56_v4 = vsub.f32 0.0, %v54_v2  ;;  %v57_v5 = vsub.f32 0.0, %v55_v3  ;;  %v70_v15 = vmax.f32 %v68_v12, 0.0  ;;  %v71_v21 = vmax.f32 %v69_v13, 0.0  ;;  %s154_s1 = sshll.u32 %s270_s0, 4  ;;  %s155_s1 = int_to_ptr.vmem [resolvable:$true] %s154_s1 }
  0x10   :  { %v88_v52 = vsub.f32 1.0, %v52_v40  ;;  %v89_v58 = vsub.f32 1.0, %v53_v48  ;;  %vm134_vm10 = vcmp.eq.f32.partialorder %v52_v40, 1.0  ;;  %vm135_vm11 = vcmp.eq.f32.partialorder %v53_v48, 1.0 }
  0x11   :  { %v58_v6 = vmul.f32 1.442695, %v56_v4  ;;  %v60_v7 = vmul.f32 1.442695, %v57_v5 }
  0x13   :  { %176 = vpow2.f32 %v58_v6 }
  0x14   :  { %178 = vpow2.f32 %v60_v7 }
  0x19   :  { %v177_v8 = vpop.eup %176 }
  0x1a   :  { %v179_v9 = vpop.eup %178  ;;  %v62_v10 = vadd.f32 1.0, %v177_v8 }
  0x1b   :  { %v63_v11 = vadd.f32 1.0, %v179_v9 }
  0x1c   :  { %180 = vlog2.f32 %v62_v10  ;;  %vm99_vm0 = vweird.f32 %v62_v10  ;;  %v103_v24 = vand.u32 2147483647, %v62_v10  ;;  %v105_v25 = vand.u32 2147483648, %v62_v10 }
  0x1d   :  { %182 = vrcp.f32 %v62_v10  ;;  %vm114_vm2 = vweird.f32 %v63_v11  ;;  %v118_v31 = vand.u32 2147483647, %v63_v11  ;;  %v120_v32 = vand.u32 2147483648, %v63_v11 }
  0x1e   :  { %184 = vlog2.f32 %v63_v11  ;;  %vm314_vm5 = vcmp.eq.f32.partialorder %v103_v24, 8.507059e+37  ;;  %v106_v39 = vor.u32 1.1754944e-38, %v105_v25 }
  0x1f   :  { %186 = vrcp.f32 %v63_v11  ;;  %vm119_vm7 = vcmp.eq.f32.partialorder %v118_v31, 8.507059e+37  ;;  %v121_v46 = vor.u32 1.1754944e-38, %v120_v32 }
  0x22   :  { %v181_v14 = vpop.eup %180 }
  0x23   :  { %v183_v17 = vpop.eup %182  ;;  %v65_v18 = vmul.f32 0.6931472, %v181_v14 }
  0x24   :  { %v185_v19 = vpop.eup %184  ;;  %v95_v20 = vmul.f32 %v183_v17, %v62_v10  ;;  %vm100_vm1 = vweird.f32 %v183_v17 }
  0x25   :  { %v187_v23 = vpop.eup %186  ;;  %v67_v26 = vmul.f32 0.6931472, %v185_v19  ;;  %v72_v27 = vadd.f32 %v70_v15, %v65_v18  ;;  %v80_v28 = vadd.f32 %v78_v16, %v65_v18  ;;  %vm310_vm4 = vmor %vm99_vm0, %vm100_vm1 }
  0x26   :  { %v96_v29 = vsub.f32 1.0, %v95_v20  ;;  %v110_v30 = vmul.f32 %v187_v23, %v63_v11  ;;  %vm115_vm3 = vweird.f32 %v187_v23 }
  0x27   :  { %v73_v34 = vadd.f32 %v71_v21, %v67_v26  ;;  %v81_v35 = vadd.f32 %v79_v22, %v67_v26  ;;  %v74_v41 = vmax.f32 %v72_v27, 1e-08  ;;  %v82_v42 = vmax.f32 %v80_v28, 1e-08  ;;  %vm320_vm6 = vmor %vm114_vm2, %vm115_vm3 }
  0x28   :  { %v97_v33 = vmul.f32 %v183_v17, %v96_v29  ;;  %v111_v36 = vsub.f32 1.0, %v110_v30 }
  0x29   :  { %v75_v49 = vmax.f32 %v73_v34, 1e-08  ;;  %v83_v50 = vmax.f32 %v81_v35, 1e-08  ;;  %v76_v54 = vmin.f32 %v74_v41, 18.420681 }
  0x2a   :  { %v98_v43 = vadd.f32 %v183_v17, %v97_v33  ;;  %v112_v44 = vmul.f32 %v187_v23, %v111_v36  ;;  %v84_v55 = vmin.f32 %v82_v42, 18.420681 }
  0x2b   :  { %v77_v61 = vmin.f32 %v75_v49, 18.420681  ;;  %v85_v62 = vmin.f32 %v83_v50, 18.420681  ;;  %v86_v3 = vmul.f32 %v76_v54, %v52_v40 }
  0x2c   :  { %v102_v47 = vsel %vm310_vm4, %v183_v17, %v98_v43  ;;  %v113_v51 = vadd.f32 %v187_v23, %v112_v44  ;;  %v90_v4 = vmul.f32 %v88_v52, %v84_v55 }
  0x2d   :  { %v107_v53 = vsel %vm314_vm5, %v106_v39, %v102_v47  ;;  %v87_v7 = vmul.f32 %v77_v61, %v53_v48  ;;  %v91_v8 = vmul.f32 %v89_v58, %v85_v62 }
  0x2e   :  { %v126_v56 = vsub.f32 1.0, %v107_v53  ;;  %v117_v57 = vsel %vm320_vm6, %v187_v23, %v113_v51  ;;  %v92_v11 = vadd.f32 %v90_v4, %v86_v3 }
  0x2f   :  { %v122_v59 = vsel %vm119_vm7, %v121_v46, %v117_v57  ;;  %v93_v14 = vadd.f32 %v91_v8, %v87_v7 }
  0x30   :  { %v128_v60 = vsel %vm124_vm8, %v107_v53, %v126_v56  ;;  %v127_v63 = vsub.f32 1.0, %v122_v59 }
  0x31   :  { %v130_v2 = vmax.f32 %v128_v60, 1e-08 }
  0x32   :  { %v129_v5 = vsel %vm125_vm9, %v122_v59, %v127_v63 }
  0x33   :  { %v132_v6 = vmin.f32 %v130_v2, 1.0  ;;  %v131_v0 = vmax.f32 %v129_v5, 1e-08 }
  0x35   :  { %v136_v9 = vsub.f32 1.0, %v132_v6  ;;  %v133_v10 = vmin.f32 %v131_v0, 1.0 }
  0x37   :  { %v138_v12 = vsel %vm134_vm10, %v136_v9, %v132_v6  ;;  %v137_v13 = vsub.f32 1.0, %v133_v10 }
  0x38   :  { %v140_v1 = vmul.f32 %v138_v12, %v138_v12 }
  0x39   :  { %v139_v15 = vsel %vm135_vm11, %v137_v13, %v133_v10 }
  0x3a   :  { %v142_v16 = vmul.f32 %v140_v1, %v92_v11  ;;  %v141_v17 = vmul.f32 %v139_v15, %v139_v15 }
  0x3c   :  { %v143_v18 = vmul.f32 %v141_v17, %v93_v14  ;;  %148 = vst [vmem:[#allocation7] sm:$0xff] %v142_v16 }
  0x3e   :  { %149 = vst [vmem:[#allocation7 + $0x8] sm:$0xff] %v143_v18 }
  0x3f   :  { %162 = dma.vmem_to_hbm [thread:$0]  %s155_s1, 256, %s157_s23, [#allocation4], %s267_s17, %s267_s17, %s268_s18  }
  0x40   :  { %264 = dma.done.wait [#allocation4], 256  }
  0x41   :  { %265 = vsyncadd [#allocation4], 4294967040 }
  0x42   :  { %167 = vsyncpa [#allocation3], 1 }
  0x43   :  { %168 = vsyncpa [#allocation6], 1 }
  0x44   :  { %169 = vsyncpa [#allocation4], 1 }

</bundles_post_ra>
